<compile_context>
chip_gen: v7x
topology: tpu7x:2x2x1
jax: 0.10.0
libtpu: 0.0.40
codegen_flags: <defaults>
</compile_context>

<pallas_src>
import functools

import jax
import jax.numpy as jnp
from jax import lax
from jax.experimental import pallas as pl
from jax.experimental.pallas import tpu as pltpu


def _dice_partial_kernel(x_ref, t_ref, inter_out, denom_out,
                         inter_acc, denom_acc, *,
                         rows_per_block, chunks_per_shard, valid_rows,
                         need_mask):
    s = pl.program_id(0)          # shard index ("parallel")
    k = pl.program_id(1)          # reduction chunk within shard ("arbitrary")

    @pl.when(k == 0)
    def _init():
        inter_acc[...] = jnp.zeros_like(inter_acc)
        denom_acc[...] = jnp.zeros_like(denom_acc)

    x = x_ref[...].astype(jnp.float32)   # (N, tr, 128)
    t = t_ref[...].astype(jnp.float32)

    if need_mask:
        # Mask rows past the valid extent: covers the partial last block and
        # fully-out-of-range (clamped duplicate) blocks of the last shard.
        chunk = s * chunks_per_shard + k
        row0 = chunk * rows_per_block
        row = lax.broadcasted_iota(jnp.int32, x.shape, 1)
        ok = (row + row0) < valid_rows
        x = jnp.where(ok, x, 0.0)
        t = jnp.where(ok, t, 0.0)

    # Fold only the row (sublane) axis per step; cross-lane reduce happens
    # once per shard in the finaliser.
    inter_acc[...] += jnp.sum(x * t, axis=1)       # (N, 128)
    denom_acc[...] += jnp.sum(x + t, axis=1)       # fused sum(x) + sum(t)

    @pl.when(k == chunks_per_shard - 1)
    def _finalize():
        inter_out[0] = jnp.sum(inter_acc[...], axis=1, keepdims=True)
        denom_out[0] = jnp.sum(denom_acc[...], axis=1, keepdims=True)


def binary_dice_loss(inputs, targets, *,
                     block_vmem_budget=8 * 1024 * 1024,
                     vmem_limit_bytes=32 * 1024 * 1024):
    """Pallas implementation of BinaryDiceLoss.forward (returns a scalar)."""
    N = targets.shape[0]
    x = inputs.reshape(N, -1)
    t = targets.reshape(N, -1)
    D = x.shape[1]

    rem = D % 128
    if rem:
        # Rare ragged-lane case: one small zero-pad (neutral for all sums).
        pad = 128 - rem
        x = jnp.pad(x, ((0, 0), (0, pad)))
        t = jnp.pad(t, ((0, 0), (0, pad)))
    R = x.shape[1] // 128                      # rows of 128 lanes per sample
    x = x.reshape(N, R, 128)
    t = t.reshape(N, R, 128)

    bx = jnp.dtype(x.dtype).itemsize
    bt = jnp.dtype(t.dtype).itemsize

    # Rows per block from the VMEM budget:
    #   2 inputs x 2 pipeline buffers x N x tr x 128 x elem <= budget
    # (assumes modest N; dice-loss batches are small).
    tr = block_vmem_budget // (2 * N * 128 * (bx + bt))
    tr = max(8, (tr // 8) * 8)
    tr = min(tr, ((R + 7) // 8) * 8)

    total_chunks = -(-R // tr)
    num_shards = 2 if total_chunks >= 2 else 1        # v7x: one per TensorCore
    chunks_per_shard = -(-total_chunks // num_shards)
    need_mask = (R % tr != 0) or (num_shards * chunks_per_shard != total_chunks)

    kernel = functools.partial(
        _dice_partial_kernel,
        rows_per_block=tr,
        chunks_per_shard=chunks_per_shard,
        valid_rows=R,
        need_mask=need_mask,
    )

    def in_map(s, k):
        # Clamp so duplicated chunks of the last shard never index OOB; the
        # kernel row-mask zeroes their contribution.
        return (0, jnp.minimum(s * chunks_per_shard + k, total_chunks - 1), 0)

    def out_map(s, k):
        return (s, 0, 0)

    cost = pl.CostEstimate(
        flops=4 * N * D,
        transcendentals=0,
        bytes_accessed=N * R * 128 * (bx + bt) + 2 * num_shards * N * 4,
    )

    inter_p, denom_p = pl.pallas_call(
        kernel,
        out_shape=(
            jax.ShapeDtypeStruct((num_shards, N, 1), jnp.float32),
            jax.ShapeDtypeStruct((num_shards, N, 1), jnp.float32),
        ),
        grid_spec=pltpu.PrefetchScalarGridSpec(
            num_scalar_prefetch=0,
            grid=(num_shards, chunks_per_shard),
            in_specs=[
                pl.BlockSpec((N, tr, 128), in_map),
                pl.BlockSpec((N, tr, 128), in_map),
            ],
            out_specs=[
                pl.BlockSpec((1, N, 1), out_map),
                pl.BlockSpec((1, N, 1), out_map),
            ],
            scratch_shapes=[
                pltpu.VMEM((N, 128), jnp.float32),
                pltpu.VMEM((N, 128), jnp.float32),
            ],
        ),
        compiler_params=pltpu.CompilerParams(
            dimension_semantics=("parallel", "arbitrary"),
            vmem_limit_bytes=vmem_limit_bytes,
        ),
        cost_estimate=cost,
    )(x, t)

    # Tiny finalisation in plain JAX on the per-shard partials.
    smooth = jnp.float32(1.0)
    inter = jnp.sum(inter_p[:, :, 0], axis=0)          # (N,)
    denom = jnp.sum(denom_p[:, :, 0], axis=0)          # (N,)
    dice = (2.0 * inter + smooth) / (denom + smooth)
    return jnp.float32(1.0) - jnp.sum(dice) / jnp.float32(N)


def _reference(inputs, targets):
    N = targets.shape[0]
    smooth = 1.0
    x = inputs.reshape(N, -1).astype(jnp.float32)
    t = targets.reshape(N, -1).astype(jnp.float32)
    inter = (x * t).sum(axis=1)
    dice = (2.0 * inter + smooth) / (x.sum(axis=1) + t.sum(axis=1) + smooth)
    return 1.0 - dice.sum() / N


if __name__ == "__main__":
    key = jax.random.PRNGKey(0)
    k1, k2 = jax.random.split(key)
    # small shapes consistent with a binary segmentation loss: NCHW
    x = jax.nn.sigmoid(jax.random.normal(k1, (2, 4, 16, 16), dtype=jnp.float32))
    y = (jax.random.uniform(k2, (2, 4, 16, 16)) > 0.5).astype(jnp.float32)

    loss = jax.block_until_ready(binary_dice_loss(x, y))
    ref = jax.block_until_ready(_reference(x, y))

    assert jnp.allclose(loss, ref, rtol=1e-5, atol=1e-5), (loss, ref)
    print("KERNEL_OK")
</pallas_src>

<mosaic_0001>
module attributes {stable_mosaic.version = 11 : i64} {
  func.func @_dice_partial_kernel(%arg0: i32, %arg1: i32, %arg2: memref<2x8x128xf32, #tpu.memory_space<vmem>>, %arg3: memref<2x8x128xf32, #tpu.memory_space<vmem>>, %arg4: memref<1x2x1xf32, #tpu.memory_space<vmem>>, %arg5: memref<1x2x1xf32, #tpu.memory_space<vmem>>, %arg6: memref<2x128xf32, #tpu.memory_space<vmem>>, %arg7: memref<2x128xf32, #tpu.memory_space<vmem>>) attributes {dimension_semantics = [#tpu.dimension_semantics<parallel>, #tpu.dimension_semantics<arbitrary>], iteration_bounds = array<i64: 1, 1>, scalar_prefetch = 0 : i64, scratch_operands = 2 : i64, tpu.core_type = #tpu.core_type<tc>, window_params = [{transform_indices = @transform_0, window_bounds = array<i64: 2, 8, 128>}, {transform_indices = @transform_1, window_bounds = array<i64: 2, 8, 128>}, {transform_indices = @transform_2, window_bounds = array<i64: 1, 2, 1>}, {transform_indices = @transform_3, window_bounds = array<i64: 1, 2, 1>}]} {
    %c0_i32 = arith.constant 0 : i32
    %0 = arith.cmpi eq, %arg1, %c0_i32 : i32
    %1 = arith.extui %0 : i1 to i32
    %c0_i32_0 = arith.constant 0 : i32
    %2 = arith.cmpi ne, %1, %c0_i32_0 : i32
    scf.if %2 {
      %cst_17 = arith.constant 0.000000e+00 : f32
      %18 = vector.broadcast %cst_17 : f32 to vector<2x128xf32>
      %c0_18 = arith.constant 0 : index
      %c0_19 = arith.constant 0 : index
      %19 = vector.load %arg6[%c0_18, %c0_19] : memref<2x128xf32, #tpu.memory_space<vmem>>, vector<2x128xf32>
      tpu.vector_store %arg6[%c0_18, %c0_19], %18 {strides = array<i32>} : memref<2x128xf32, #tpu.memory_space<vmem>>, vector<2x128xf32>,
      %cst_20 = arith.constant 0.000000e+00 : f32
      %20 = vector.broadcast %cst_20 : f32 to vector<2x128xf32>
      %c0_21 = arith.constant 0 : index
      %c0_22 = arith.constant 0 : index
      %21 = vector.load %arg7[%c0_21, %c0_22] : memref<2x128xf32, #tpu.memory_space<vmem>>, vector<2x128xf32>
      tpu.vector_store %arg7[%c0_21, %c0_22], %20 {strides = array<i32>} : memref<2x128xf32, #tpu.memory_space<vmem>>, vector<2x128xf32>,
    } else {
    }
    %c0 = arith.constant 0 : index
    %c0_1 = arith.constant 0 : index
    %c0_2 = arith.constant 0 : index
    %3 = vector.load %arg2[%c0, %c0_1, %c0_2] : memref<2x8x128xf32, #tpu.memory_space<vmem>>, vector<2x8x128xf32>
    %c0_3 = arith.constant 0 : index
    %c0_4 = arith.constant 0 : index
    %c0_5 = arith.constant 0 : index
    %4 = vector.load %arg3[%c0_3, %c0_4, %c0_5] : memref<2x8x128xf32, #tpu.memory_space<vmem>>, vector<2x8x128xf32>
    %c0_6 = arith.constant 0 : index
    %c0_7 = arith.constant 0 : index
    %5 = vector.load %arg6[%c0_6, %c0_7] : memref<2x128xf32, #tpu.memory_space<vmem>>, vector<2x128xf32>
    %6 = arith.mulf %3, %4 : vector<2x8x128xf32>
    %cst = arith.constant dense<0.000000e+00> : vector<2x128xf32>
    %7 = vector.multi_reduction <add>, %6, %cst [1] : vector<2x8x128xf32> to vector<2x128xf32>
    %8 = arith.addf %5, %7 : vector<2x128xf32>
    %c0_8 = arith.constant 0 : index
    %c0_9 = arith.constant 0 : index
    %9 = vector.load %arg6[%c0_8, %c0_9] : memref<2x128xf32, #tpu.memory_space<vmem>>, vector<2x128xf32>
    tpu.vector_store %arg6[%c0_8, %c0_9], %8 {strides = array<i32>} : memref<2x128xf32, #tpu.memory_space<vmem>>, vector<2x128xf32>,
    %c0_10 = arith.constant 0 : index
    %c0_11 = arith.constant 0 : index
    %10 = vector.load %arg7[%c0_10, %c0_11] : memref<2x128xf32, #tpu.memory_space<vmem>>, vector<2x128xf32>
    %11 = arith.addf %3, %4 : vector<2x8x128xf32>
    %cst_12 = arith.constant dense<0.000000e+00> : vector<2x128xf32>
    %12 = vector.multi_reduction <add>, %11, %cst_12 [1] : vector<2x8x128xf32> to vector<2x128xf32>
    %13 = arith.addf %10, %12 : vector<2x128xf32>
    %c0_13 = arith.constant 0 : index
    %c0_14 = arith.constant 0 : index
    %14 = vector.load %arg7[%c0_13, %c0_14] : memref<2x128xf32, #tpu.memory_space<vmem>>, vector<2x128xf32>
    tpu.vector_store %arg7[%c0_13, %c0_14], %13 {strides = array<i32>} : memref<2x128xf32, #tpu.memory_space<vmem>>, vector<2x128xf32>,
    %c0_i32_15 = arith.constant 0 : i32
    %15 = arith.cmpi eq, %arg1, %c0_i32_15 : i32
    %16 = arith.extui %15 : i1 to i32
    %c0_i32_16 = arith.constant 0 : i32
    %17 = arith.cmpi ne, %16, %c0_i32_16 : i32
    scf.if %17 {
      %c0_17 = arith.constant 0 : index
      %c0_18 = arith.constant 0 : index
      %18 = vector.load %arg6[%c0_17, %c0_18] : memref<2x128xf32, #tpu.memory_space<vmem>>, vector<2x128xf32>
      %cst_19 = arith.constant dense<0.000000e+00> : vector<2xf32>
      %19 = vector.multi_reduction <add>, %18, %cst_19 [1] : vector<2x128xf32> to vector<2xf32>
      %20 = vector.shape_cast %19 : vector<2xf32> to vector<2x1xf32>
      %c0_20 = arith.constant 0 : index
      %c0_21 = arith.constant 0 : index
      %c0_22 = arith.constant 0 : index
      %21 = vector.load %arg4[%c0_20, %c0_21, %c0_22] : memref<1x2x1xf32, #tpu.memory_space<vmem>>, vector<1x2x1xf32>
      %22 = vector.shape_cast %21 : vector<1x2x1xf32> to vector<2x1xf32>
      %23 = vector.shape_cast %20 : vector<2x1xf32> to vector<1x2x1xf32>
      tpu.vector_store %arg4[%c0_20, %c0_21, %c0_22], %23 {strides = array<i32>} : memref<1x2x1xf32, #tpu.memory_space<vmem>>, vector<1x2x1xf32>,
      %c0_23 = arith.constant 0 : index
      %c0_24 = arith.constant 0 : index
      %24 = vector.load %arg7[%c0_23, %c0_24] : memref<2x128xf32, #tpu.memory_space<vmem>>, vector<2x128xf32>
      %cst_25 = arith.constant dense<0.000000e+00> : vector<2xf32>
      %25 = vector.multi_reduction <add>, %24, %cst_25 [1] : vector<2x128xf32> to vector<2xf32>
      %26 = vector.shape_cast %25 : vector<2xf32> to vector<2x1xf32>
      %c0_26 = arith.constant 0 : index
      %c0_27 = arith.constant 0 : index
      %c0_28 = arith.constant 0 : index
      %27 = vector.load %arg5[%c0_26, %c0_27, %c0_28] : memref<1x2x1xf32, #tpu.memory_space<vmem>>, vector<1x2x1xf32>
      %28 = vector.shape_cast %27 : vector<1x2x1xf32> to vector<2x1xf32>
      %29 = vector.shape_cast %26 : vector<2x1xf32> to vector<1x2x1xf32>
      tpu.vector_store %arg5[%c0_26, %c0_27, %c0_28], %29 {strides = array<i32>} : memref<1x2x1xf32, #tpu.memory_space<vmem>>, vector<1x2x1xf32>,
    } else {
    }
    return
  }
  func.func @transform_0(%arg0: i32, %arg1: i32) -> (i32, i32, i32) {
    %c1_i32 = arith.constant 1 : i32
    %0 = arith.muli %arg0, %c1_i32 : i32
    %1 = arith.addi %0, %arg1 : i32
    %c0_i32 = arith.constant 0 : i32
    %2 = arith.minsi %1, %c0_i32 : i32
    %c0_i32_0 = arith.constant 0 : i32
    %c0_i32_1 = arith.constant 0 : i32
    %c0_i32_2 = arith.constant 0 : i32
    return %c0_i32_0, %2, %c0_i32_1 : i32, i32, i32
  }
  func.func @transform_1(%arg0: i32, %arg1: i32) -> (i32, i32, i32) {
    %c1_i32 = arith.constant 1 : i32
    %0 = arith.muli %arg0, %c1_i32 : i32
    %1 = arith.addi %0, %arg1 : i32
    %c0_i32 = arith.constant 0 : i32
    %2 = arith.minsi %1, %c0_i32 : i32
    %c0_i32_0 = arith.constant 0 : i32
    %c0_i32_1 = arith.constant 0 : i32
    %c0_i32_2 = arith.constant 0 : i32
    return %c0_i32_0, %2, %c0_i32_1 : i32, i32, i32
  }
  func.func @transform_2(%arg0: i32, %arg1: i32) -> (i32, i32, i32) {
    %c0_i32 = arith.constant 0 : i32
    %c0_i32_0 = arith.constant 0 : i32
    %c0_i32_1 = arith.constant 0 : i32
    return %arg0, %c0_i32, %c0_i32_0 : i32, i32, i32
  }
  func.func @transform_3(%arg0: i32, %arg1: i32) -> (i32, i32, i32) {
    %c0_i32 = arith.constant 0 : i32
    %c0_i32_0 = arith.constant 0 : i32
    %c0_i32_1 = arith.constant 0 : i32
    return %arg0, %c0_i32, %c0_i32_0 : i32, i32, i32
  }
}

</mosaic_0001>

<bundles_post_ra>
// kernel: tpu_custom_call.1
= control target key start
LH: loop header
LB: loop body
LE: loop exit
PB: predicated region body
PF: predicated region fallthrough
CT: control target
= control target key end

     0   :  { %9 = vsyncpa [#allocation5], 0  ;;  %s247_s0 = inlined_call_operand.hbm [shape: f32[2,8,128], index: 0, kind: input, shape index: {}]   ;;  %s248_s1 = inlined_call_operand.hbm [shape: f32[2,8,128], index: 1, kind: input, shape index: {}]   ;;  %s249_s2 = inlined_call_operand.vmem [shape: f32[1,2,1], index: 2, kind: output, shape index: {0}]   ;;  %s250_s3 = inlined_call_operand.vmem [shape: f32[1,2,1], index: 3, kind: output, shape index: {1}]  }
   0x1   :  { %10 = vsyncpa [#allocation7], 0  ;;  %s192_s12 = smov [#allocation4]   ;;  %s144_s16 = scalar_lea.hbm %s247_s0, 256 }
   0x2   :  { %s21_s13 = sshll.u32 %s192_s12, 4  ;;  %p145_p0 = scmp.ne.s32.totalorder %s247_s0, %s144_s16  ;;  %s22_s13 = int_to_ptr.vmem [resolvable:$true] %s21_s13 }
   0x3   :  { %p148_p1 = scmp.lt.u32.totalorder %s144_s16, %s247_s0 }
   0x5   :  { %p150_p2 = pnand %p148_p1, %p145_p0 }
   0x7   :  { %153 = shalt.err (!%p150_p2)
}
   0x8   :  { %s154_s21 = scalar_lea.vmem %s22_s13, 256  ;;  %p159_p4 = scmp.lt.s32.totalorder %s22_s13, %s22_s13 }
   0x9   :  { %p155_p3 = scmp.ne.s32.totalorder %s22_s13, %s154_s21  ;;  %p160_p5 = scmp.lt.s32.totalorder %s154_s21, %s154_s21 }
   0xb   :  { %p161_p6 = por %p160_p5, %p159_p4 }
   0xd   :  { %p162_p7 = pnand %p161_p6, %p155_p3 }
   0xf   :  { %165 = shalt.err (!%p162_p7)
}
  0x10   :  { %s193_s22 = smov 128   ;;  %s194_s23 = smov 8  }
  0x11   :  { %27 = dma.hbm_to_vmem [thread:$0]  %s247_s0, 256, %s22_s13, [#allocation5], %s193_s22, %s193_s22, %s194_s23  }
  0x12   :  { %s195_s26 = smov [#allocation6]   ;;  %s166_s30 = scalar_lea.hbm %s248_s1, 256 }
  0x13   :  { %s38_s27 = sshll.u32 %s195_s26, 4  ;;  %p167_p8 = scmp.ne.s32.totalorder %s248_s1, %s166_s30  ;;  %s39_s27 = int_to_ptr.vmem [resolvable:$true] %s38_s27 }
  0x14   :  { %p170_p9 = scmp.lt.u32.totalorder %s166_s30, %s248_s1 }
  0x16   :  { %p172_p10 = pnand %p170_p9, %p167_p8 }
  0x18   :  { %175 = shalt.err (!%p172_p10)
}
  0x19   :  { %s176_s8 = scalar_lea.vmem %s39_s27, 256  ;;  %p181_p12 = scmp.lt.s32.totalorder %s39_s27, %s39_s27 }
  0x1a   :  { %p177_p11 = scmp.ne.s32.totalorder %s39_s27, %s176_s8  ;;  %p182_p13 = scmp.lt.s32.totalorder %s176_s8, %s176_s8 }
  0x1c   :  { %p183_p0 = por %p182_p13, %p181_p12 }
  0x1e   :  { %p184_p1 = pnand %p183_p0, %p177_p11 }
  0x20   :  { %187 = shalt.err (!%p184_p1)
}
  0x21   :  { %44 = dma.hbm_to_vmem [thread:$0]  %s248_s1, 256, %s39_s27, [#allocation7], %s193_s22, %s193_s22, %s194_s23  }
  0x22   :  { %188 = dma.done.wait [#allocation5], 256  }
  0x23   :  { %189 = vsyncadd [#allocation5], 4294967040 }
  0x24   :  { %190 = dma.done.wait [#allocation7], 256  }
  0x25   :  { %191 = vsyncadd [#allocation7], 4294967040  ;;  %v196_v0 = vmov 0.0   ;;  %v63_v1 = vld [vmem:[#allocation4] sm:$0xff]  ;;  %v64_v2 = vld [vmem:[#allocation4 + $0x8] sm:$0xff]  ;;  %vm84_vm0 = vcmask 1041409  }
  0x26   :  { %61 = vst [vmem:[#allocation2] sm:$0x3] %v196_v0  ;;  %62 = vst [vmem:[#allocation3] sm:$0x3] %v196_v0  ;;  %v65_v3 = vld [vmem:[#allocation6] sm:$0xff]  ;;  %v66_v4 = vld [vmem:[#allocation6 + $0x8] sm:$0xff] }
  0x27   :  { %v68_v5 = vmul.f32 %v65_v3, %v63_v1  ;;  %v90_v6 = vadd.f32 %v65_v3, %v63_v1  ;;  %v69_v7 = vmul.f32 %v66_v4, %v64_v2  ;;  %v91_v8 = vadd.f32 %v66_v4, %v64_v2 }
  0x28   :  { %vm114_vm1 = vcmask 1041408   ;;  %vm118_vm2 = vcmask 1024  }
  0x29   :  { %v70_v9 = vrot.slane %v68_v5, 4  ;;  %v92_v10 = vrot.slane %v90_v6, 4  ;;  %v76_v11 = vrot.slane %v69_v7, 4  ;;  %v98_v12 = vrot.slane %v91_v8, 4 }
  0x2b   :  { %v71_v13 = vadd.f32 %v70_v9, %v68_v5  ;;  %v93_v14 = vadd.f32 %v92_v10, %v90_v6  ;;  %v77_v15 = vadd.f32 %v76_v11, %v69_v7  ;;  %v99_v16 = vadd.f32 %v98_v12, %v91_v8 }
  0x2d   :  { %v72_v17 = vrot.slane %v71_v13, 2  ;;  %v94_v18 = vrot.slane %v93_v14, 2  ;;  %v78_v19 = vrot.slane %v77_v15, 2  ;;  %v100_v20 = vrot.slane %v99_v16, 2  ;;  %v67_v31 = vld [vmem:[#allocation2] sm:$0x3] }
  0x2e   :  { %v89_v33 = vld [vmem:[#allocation3] sm:$0x3] }
  0x2f   :  { %v73_v21 = vadd.f32 %v72_v17, %v71_v13  ;;  %v95_v22 = vadd.f32 %v94_v18, %v93_v14  ;;  %v79_v23 = vadd.f32 %v78_v19, %v77_v15  ;;  %v101_v24 = vadd.f32 %v100_v20, %v99_v16 }
  0x31   :  { %v74_v25 = vrot.slane %v73_v21, 1  ;;  %v96_v26 = vrot.slane %v95_v22, 1  ;;  %v80_v27 = vrot.slane %v79_v23, 1  ;;  %v102_v28 = vrot.slane %v101_v24, 1 }
  0x33   :  { %v75_v29 = vadd.f32 %v74_v25, %v73_v21  ;;  %v97_v30 = vadd.f32 %v96_v26, %v95_v22  ;;  %v81_v32 = vadd.f32 %v80_v27, %v79_v23  ;;  %v103_v34 = vadd.f32 %v102_v28, %v101_v24 }
  0x35   :  { %v85_v35 = vsel %vm84_vm0, %v81_v32, %v75_v29  ;;  %v106_v36 = vsel %vm84_vm0, %v103_v34, %v97_v30 }
  0x36   :  { %v87_v37 = vadd.f32 %v85_v35, %v67_v31  ;;  %v108_v38 = vadd.f32 %v106_v36, %v89_v33 }
  0x38   :  { %88 = vst [vmem:[#allocation2] sm:$0x3] %v87_v37  ;;  %109 = vst [vmem:[#allocation3] sm:$0x3] %v108_v38 }
  0x3f   :  { %v113_v39 = vld [vmem:[#allocation2] sm:$0x3]  ;;  %v120_v40 = vld [vmem:[#allocation3] sm:$0x3] }
  0x40   :  { %v115_v41 = vsel %vm114_vm1, %v113_v39, 0.0  ;;  %v121_v42 = vsel %vm114_vm1, %v120_v40, 0.0 }
  0x41   :  { %116 = vadd.xlane.f32.xlu0 %v115_v41 }
  0x45   :  { %122 = vadd.xlane.f32.xlu0 %v121_v42 }
  0xce   :  { %v117_v43 = vpop.xlane.xlu0 %116 }
  0xcf   :  { %119 = vst.msk [vmem:[%s249_s2] sm:$0x3] %vm118_vm2, %v117_v43 }
  0xd2   :  { %v123_v44 = vpop.xlane.xlu0 %122 }
  0xd3   :  { %124 = vst.msk [vmem:[%s250_s3] sm:$0x3] %vm118_vm2, %v123_v44 }
  0xd4   :  { %133 = vsyncpa [#allocation5], 1 }
  0xd5   :  { %134 = vsyncpa [#allocation7], 1 }

</bundles_post_ra>
